<compile_context>
chip_gen: v7x
topology: tpu7x:2x2x1
jax: 0.10.0
libtpu: 0.0.40
codegen_flags: <defaults>
</compile_context>

<pallas_src>
import jax
import jax.numpy as jnp
from jax.experimental import pallas as pl
from jax.experimental.pallas import tpu as pltpu

NUM_MATERIALS = 5
C, H, W = 16, 1, 9           # self.input_shape
IN_FEATS = C * H * W         # 144
H1, H2 = 200, 250            # logical hidden widths
H1P, H2P = 256, 256          # lane-padded hidden widths
OUT_PAD = 128                # lane-dense output width (first 5 lanes are real)
BN_EPS = 1e-5
NEG_BIG = -1e30              # pad-class bias -> softmax probability underflows to 0
MAX_TB = 1024                # batch-tile cap (VMEM stays < ~4 MiB even at this size)


def _round_up(n, m):
    return ((n + m - 1) // m) * m


def _cdiv(a, b):
    return -(-a // b)


# ----------------------------------------------------------------------------- kernel
def _mlp_kernel(x_ref,                       # (TB, 144)  raw flattened input tile (f32)
                w1_ref, b1_ref,              # (144, 256) bf16, (1, 256) f32   [BN2d+BN1d(200) folded]
                w2_ref, b2_ref,              # (256, 256) bf16, (1, 256) f32   [BN1d(250) folded]
                w3_ref, b3_ref,              # (256, 128) bf16, (1, 128) f32   [pad bias = -1e30]
                o_ref):                      # (TB, 128)  bf16 softmax probabilities
    # Layer 1: Linear(144->256) with BN2d + BN1d(200) pre-folded, then ReLU.
    x = x_ref[...].astype(jnp.bfloat16)
    z1 = jnp.dot(x, w1_ref[...], preferred_element_type=jnp.float32) + b1_ref[...]
    h1 = jnp.maximum(z1, 0.0)

    # Layer 2: Linear(256->256) with BN1d(250) pre-folded, then ReLU.
    z2 = jnp.dot(h1.astype(jnp.bfloat16), w2_ref[...],
                 preferred_element_type=jnp.float32) + b2_ref[...]
    h2 = jnp.maximum(z2, 0.0)

    # Layer 3: Linear(256->128), bf16 weights / activations, f32 accumulation.
    logits = jnp.dot(h2.astype(jnp.bfloat16), w3_ref[...],
                     preferred_element_type=jnp.float32) + b3_ref[...]

    # Softmax over the 128 lanes in f32 (pad lanes have logit -1e30 -> exp == 0).
    m = jnp.max(logits, axis=1, keepdims=True)
    e = jnp.exp(logits - m)
    denom = jnp.sum(e, axis=1, keepdims=True)
    o_ref[...] = (e * pl.reciprocal(denom, approx=True)).astype(o_ref.dtype)


# ----------------------------------------------------------------------------- params
def _fold_bn(gamma, beta, mean, var, eps=BN_EPS):
    """(scale, shift) s.t. x*scale + shift == gamma*(x-mean)/sqrt(var+eps) + beta."""
    scale = gamma / jnp.sqrt(var + eps)
    shift = beta - mean * scale
    return scale, shift


def init_raw_params(key):
    """Deterministic 'PyTorch-like' raw parameters (Linear + BN weights/stats)."""
    ks = jax.random.split(key, 18)
    r = {}
    r["w1"] = jax.random.normal(ks[0], (IN_FEATS, H1), jnp.float32) * 0.05
    r["b1"] = jax.random.normal(ks[1], (H1,), jnp.float32) * 0.01
    r["w2"] = jax.random.normal(ks[2], (H1, H2), jnp.float32) * 0.05
    r["b2"] = jax.random.normal(ks[3], (H2,), jnp.float32) * 0.01
    r["w3"] = jax.random.normal(ks[4], (H2, NUM_MATERIALS), jnp.float32) * 0.05
    r["b3"] = jax.random.normal(ks[5], (NUM_MATERIALS,), jnp.float32) * 0.01
    # BatchNorm2d(16): affine params + running statistics (inference mode).
    r["g0"] = 1.0 + 0.1 * jax.random.normal(ks[6], (C,), jnp.float32)
    r["be0"] = 0.1 * jax.random.normal(ks[7], (C,), jnp.float32)
    r["mu0"] = 0.1 * jax.random.normal(ks[8], (C,), jnp.float32)
    r["var0"] = 1.0 + 0.1 * jax.random.uniform(ks[9], (C,), jnp.float32)
    # BatchNorm1d(200)
    r["g1"] = 1.0 + 0.1 * jax.random.normal(ks[10], (H1,), jnp.float32)
    r["be1"] = 0.1 * jax.random.normal(ks[11], (H1,), jnp.float32)
    r["mu1"] = 0.1 * jax.random.normal(ks[12], (H1,), jnp.float32)
    r["var1"] = 1.0 + 0.1 * jax.random.uniform(ks[13], (H1,), jnp.float32)
    # BatchNorm1d(250)
    r["g2"] = 1.0 + 0.1 * jax.random.normal(ks[14], (H2,), jnp.float32)
    r["be2"] = 0.1 * jax.random.normal(ks[15], (H2,), jnp.float32)
    r["mu2"] = 0.1 * jax.random.normal(ks[16], (H2,), jnp.float32)
    r["var2"] = 1.0 + 0.1 * jax.random.uniform(ks[17], (H2,), jnp.float32)
    return r


def prepare_params(raw):
    """Fold every BN affine + Linear bias into the weights, pad to lane-dense
    shapes, and cast all weight matrices to bf16 (biases stay f32)."""
    s0, t0 = _fold_bn(raw["g0"], raw["be0"], raw["mu0"], raw["var0"])
    # NCHW flatten: feature f belongs to channel f // (H*W) -> repeat per-channel values.
    s0f = jnp.repeat(s0, H * W)                      # (144,)
    t0f = jnp.repeat(t0, H * W)
    s1, t1 = _fold_bn(raw["g1"], raw["be1"], raw["mu1"], raw["var1"])
    s2, t2 = _fold_bn(raw["g2"], raw["be2"], raw["mu2"], raw["var2"])

    # Layer 1: relu(((x*s0+t0) @ w1 + b1) * s1 + t1)  ==  relu(x @ w1f + b1f)
    w1f = (s0f[:, None] * raw["w1"]) * s1[None, :]
    b1f = (t0f @ raw["w1"] + raw["b1"]) * s1 + t1
    # Layer 2: relu((h1 @ w2 + b2) * s2 + t2)  ==  relu(h1 @ w2f + b2f)
    w2f = raw["w2"] * s2[None, :]
    b2f = raw["b2"] * s2 + t2
    w3f, b3f = raw["w3"], raw["b3"]

    # Zero-pad to lane multiples; output bias pad = -1e30 so softmax ignores pad classes.
    w1p = jnp.zeros((IN_FEATS, H1P), jnp.float32).at[:, :H1].set(w1f)
    b1p = jnp.zeros((1, H1P), jnp.float32).at[0, :H1].set(b1f)
    w2p = jnp.zeros((H1P, H2P), jnp.float32).at[:H1, :H2].set(w2f)
    b2p = jnp.zeros((1, H2P), jnp.float32).at[0, :H2].set(b2f)
    w3p = jnp.zeros((H2P, OUT_PAD), jnp.float32).at[:H2, :NUM_MATERIALS].set(w3f)
    b3p = jnp.full((1, OUT_PAD), NEG_BIG, jnp.float32).at[0, :NUM_MATERIALS].set(b3f)

    return {
        "w1": w1p.astype(jnp.bfloat16), "b1": b1p,
        "w2": w2p.astype(jnp.bfloat16), "b2": b2p,
        "w3": w3p.astype(jnp.bfloat16), "b3": b3p,
    }


# ----------------------------------------------------------------------------- wrapper
def material_detection_forward(x_nchw, p):
    """x_nchw: (B, 16, 1, 9) float32 -> (B, NUM_MATERIALS) softmax probabilities (f32)."""
    B = x_nchw.shape[0]
    # nn.Flatten on NCHW: row-major flatten of (C, H, W) per sample.
    # TODO(synk): if the upstream producer can emit this already flattened in bf16,
    # accept that directly (halves input DMA); a standalone wrapper cast nets ~zero.
    x_flat = x_nchw.reshape(B, IN_FEATS).astype(jnp.float32)

    # Batch tile: multiple of 8 sublanes, capped at 1024 rows, and sized so large
    # batches produce >= 2 "parallel" grid steps (v7x has 2 TensorCores per chip).
    TB = max(8, min(MAX_TB, _round_up(_cdiv(B, 2), 8)))
    n_steps = _cdiv(B, TB)          # ragged final block: OOB rows discarded on writeback

    rows = n_steps * TB
    flops = 2 * rows * (IN_FEATS * H1P + H1P * H2P + H2P * OUT_PAD)
    bytes_accessed = (
        x_flat.size * 4                                   # f32 input
        + rows * OUT_PAD * 2                              # bf16 output
        + (p["w1"].size + p["w2"].size + p["w3"].size) * 2
        + (p["b1"].size + p["b2"].size + p["b3"].size) * 4)
    cost = pl.CostEstimate(flops=int(flops),
                           transcendentals=int(rows * OUT_PAD),
                           bytes_accessed=int(bytes_accessed))

    def resident(shape):   # weights: same block every grid step -> stay VMEM-resident
        return pl.BlockSpec(shape, lambda i: (0, 0))

    out = pl.pallas_call(
        _mlp_kernel,
        out_shape=jax.ShapeDtypeStruct((B, OUT_PAD), jnp.bfloat16),
        grid=(n_steps,),
        in_specs=[
            pl.BlockSpec((TB, IN_FEATS), lambda i: (i, 0)),
            resident((IN_FEATS, H1P)), resident((1, H1P)),
            resident((H1P, H2P)), resident((1, H2P)),
            resident((H2P, OUT_PAD)), resident((1, OUT_PAD)),
        ],
        out_specs=pl.BlockSpec((TB, OUT_PAD), lambda i: (i, 0)),
        compiler_params=pltpu.CompilerParams(dimension_semantics=("parallel",)),
        cost_estimate=cost,
    )(x_flat, p["w1"], p["b1"], p["w2"], p["b2"], p["w3"], p["b3"])

    return out[:, :NUM_MATERIALS].astype(jnp.float32)


# ----------------------------------------------------------------------------- references
def _reference_module(x_nchw, raw):
    """fp32, unfolded: exact inference-mode semantics of the PyTorch module."""
    B = x_nchw.shape[0]
    s0, t0 = _fold_bn(raw["g0"], raw["be0"], raw["mu0"], raw["var0"])
    s1, t1 = _fold_bn(raw["g1"], raw["be1"], raw["mu1"], raw["var1"])
    s2, t2 = _fold_bn(raw["g2"], raw["be2"], raw["mu2"], raw["var2"])
    x = x_nchw.reshape(B, IN_FEATS)
    h0 = x * jnp.repeat(s0, H * W) + jnp.repeat(t0, H * W)
    h1 = jnp.maximum((h0 @ raw["w1"] + raw["b1"]) * s1 + t1, 0.0)
    h2 = jnp.maximum((h1 @ raw["w2"] + raw["b2"]) * s2 + t2, 0.0)
    logits = h2 @ raw["w3"] + raw["b3"]
    return jax.nn.softmax(logits, axis=1)


def _reference_prepared(x_nchw, p):
    """Pure-JAX mirror of the kernel math (same folded/padded/bf16 params);
    softmax kept in exact f32 (no approx reciprocal / bf16 output quantization)."""
    B = x_nchw.shape[0]
    x = x_nchw.reshape(B, IN_FEATS).astype(jnp.bfloat16)
    z1 = jnp.dot(x, p["w1"], preferred_element_type=jnp.float32) + p["b1"]
    h1 = jnp.maximum(z1, 0.0)
    z2 = jnp.dot(h1.astype(jnp.bfloat16), p["w2"],
                 preferred_element_type=jnp.float32) + p["b2"]
    h2 = jnp.maximum(z2, 0.0)
    logits = jnp.dot(h2.astype(jnp.bfloat16), p["w3"],
                     preferred_element_type=jnp.float32) + p["b3"]
    return jax.nn.softmax(logits, axis=1)[:, :NUM_MATERIALS]


# ----------------------------------------------------------------------------- main
if __name__ == "__main__":
    key = jax.random.PRNGKey(0)
    k_x, k_p, k_x2 = jax.random.split(key, 3)

    raw = init_raw_params(k_p)
    params = prepare_params(raw)

    # --- main test: B = 8 (exact blocks) ---
    B = 8
    x = jax.random.normal(k_x, (B, C, H, W), jnp.float32)   # (8, 16, 1, 9) NCHW
    out = jax.block_until_ready(material_detection_forward(x, params))
    assert out.shape == (B, NUM_MATERIALS)

    # Rows sum to ~1 (approx reciprocal + bf16 output quantization).
    assert jnp.allclose(jnp.sum(out, axis=1), 1.0, atol=1e-2)

    # Implementation fidelity: kernel vs pure-JAX mirror with identical folded /
    # padded / bf16 params (differences: accumulation order, approx reciprocal,
    # bf16 store of the probabilities).
    ref_impl = _reference_prepared(x, params)
    assert jnp.allclose(out, ref_impl, atol=6e-3, rtol=0)

    # Module semantics: kernel vs fp32 unfolded BN/Linear/Softmax reference
    # (additionally includes bf16 quantization of weights/activations).
    ref_mod = _reference_module(x, raw)
    assert jnp.allclose(out, ref_mod, atol=2e-2, rtol=0)

    # --- ragged test: B = 13 (multi-step grid, partial final block, no wrapper pad) ---
    B2 = 13
    x2 = jax.random.normal(k_x2, (B2, C, H, W), jnp.float32)
    out2 = jax.block_until_ready(material_detection_forward(x2, params))
    assert out2.shape == (B2, NUM_MATERIALS)
    assert jnp.allclose(jnp.sum(out2, axis=1), 1.0, atol=1e-2)
    assert jnp.allclose(out2, _reference_module(x2, raw), atol=2e-2, rtol=0)

    print("KERNEL_OK")
</pallas_src>

<mosaic_0001>
module attributes {stable_mosaic.version = 11 : i64} {
  func.func @_mlp_kernel(%arg0: i32, %arg1: memref<8x144xf32, #tpu.memory_space<vmem>>, %arg2: memref<144x256xbf16, #tpu.memory_space<vmem>>, %arg3: memref<1x256xf32, #tpu.memory_space<vmem>>, %arg4: memref<256x256xbf16, #tpu.memory_space<vmem>>, %arg5: memref<1x256xf32, #tpu.memory_space<vmem>>, %arg6: memref<256x128xbf16, #tpu.memory_space<vmem>>, %arg7: memref<1x128xf32, #tpu.memory_space<vmem>>, %arg8: memref<8x128xbf16, #tpu.memory_space<vmem>>) attributes {dimension_semantics = [#tpu.dimension_semantics<parallel>], iteration_bounds = array<i64: 1>, scalar_prefetch = 0 : i64, scratch_operands = 0 : i64, tpu.core_type = #tpu.core_type<tc>, window_params = [{transform_indices = @transform_0, window_bounds = array<i64: 8, 144>}, {pipeline_mode = #tpu.pipeline_mode<synchronous>, transform_indices = @transform_1, window_bounds = array<i64: 144, 256>}, {pipeline_mode = #tpu.pipeline_mode<synchronous>, transform_indices = @transform_2, window_bounds = array<i64: 1, 256>}, {pipeline_mode = #tpu.pipeline_mode<synchronous>, transform_indices = @transform_3, window_bounds = array<i64: 256, 256>}, {pipeline_mode = #tpu.pipeline_mode<synchronous>, transform_indices = @transform_4, window_bounds = array<i64: 1, 256>}, {pipeline_mode = #tpu.pipeline_mode<synchronous>, transform_indices = @transform_5, window_bounds = array<i64: 256, 128>}, {pipeline_mode = #tpu.pipeline_mode<synchronous>, transform_indices = @transform_6, window_bounds = array<i64: 1, 128>}, {transform_indices = @transform_7, window_bounds = array<i64: 8, 128>}]} {
    %c0 = arith.constant 0 : index
    %c0_0 = arith.constant 0 : index
    %0 = vector.load %arg1[%c0, %c0_0] : memref<8x144xf32, #tpu.memory_space<vmem>>, vector<8x144xf32>
    %1 = arith.truncf %0 : vector<8x144xf32> to vector<8x144xbf16>
    %c0_1 = arith.constant 0 : index
    %c0_2 = arith.constant 0 : index
    %2 = vector.load %arg2[%c0_1, %c0_2] : memref<144x256xbf16, #tpu.memory_space<vmem>>, vector<144x256xbf16>
    %cst = arith.constant dense<0.000000e+00> : vector<8x256xf32>
    %3 = tpu.matmul %1, %2, %cst {dimension_numbers = #tpu.dot_dimension_numbers<[1], [0], [0], [1], [0, 0, 1, 1], [], []>} : vector<8x144xbf16>, vector<144x256xbf16>, vector<8x256xf32> -> vector<8x256xf32>
    %c0_3 = arith.constant 0 : index
    %c0_4 = arith.constant 0 : index
    %4 = vector.load %arg3[%c0_3, %c0_4] : memref<1x256xf32, #tpu.memory_space<vmem>>, vector<1x256xf32>
    %5 = vector.broadcast %4 : vector<1x256xf32> to vector<8x256xf32>
    %6 = arith.addf %3, %5 : vector<8x256xf32>
    %cst_5 = arith.constant 0.000000e+00 : f32
    %7 = vector.broadcast %cst_5 : f32 to vector<8x256xf32>
    %8 = arith.maximumf %6, %7 : vector<8x256xf32>
    %9 = arith.truncf %8 : vector<8x256xf32> to vector<8x256xbf16>
    %c0_6 = arith.constant 0 : index
    %c0_7 = arith.constant 0 : index
    %10 = vector.load %arg4[%c0_6, %c0_7] : memref<256x256xbf16, #tpu.memory_space<vmem>>, vector<256x256xbf16>
    %cst_8 = arith.constant dense<0.000000e+00> : vector<8x256xf32>
    %11 = tpu.matmul %9, %10, %cst_8 {dimension_numbers = #tpu.dot_dimension_numbers<[1], [0], [0], [1], [0, 0, 1, 1], [], []>} : vector<8x256xbf16>, vector<256x256xbf16>, vector<8x256xf32> -> vector<8x256xf32>
    %c0_9 = arith.constant 0 : index
    %c0_10 = arith.constant 0 : index
    %12 = vector.load %arg5[%c0_9, %c0_10] : memref<1x256xf32, #tpu.memory_space<vmem>>, vector<1x256xf32>
    %13 = vector.broadcast %12 : vector<1x256xf32> to vector<8x256xf32>
    %14 = arith.addf %11, %13 : vector<8x256xf32>
    %cst_11 = arith.constant 0.000000e+00 : f32
    %15 = vector.broadcast %cst_11 : f32 to vector<8x256xf32>
    %16 = arith.maximumf %14, %15 : vector<8x256xf32>
    %17 = arith.truncf %16 : vector<8x256xf32> to vector<8x256xbf16>
    %c0_12 = arith.constant 0 : index
    %c0_13 = arith.constant 0 : index
    %18 = vector.load %arg6[%c0_12, %c0_13] : memref<256x128xbf16, #tpu.memory_space<vmem>>, vector<256x128xbf16>
    %cst_14 = arith.constant dense<0.000000e+00> : vector<8x128xf32>
    %19 = tpu.matmul %17, %18, %cst_14 {dimension_numbers = #tpu.dot_dimension_numbers<[1], [0], [0], [1], [0, 0, 1, 1], [], []>} : vector<8x256xbf16>, vector<256x128xbf16>, vector<8x128xf32> -> vector<8x128xf32>
    %c0_15 = arith.constant 0 : index
    %c0_16 = arith.constant 0 : index
    %20 = vector.load %arg7[%c0_15, %c0_16] : memref<1x128xf32, #tpu.memory_space<vmem>>, vector<1x128xf32>
    %21 = vector.broadcast %20 : vector<1x128xf32> to vector<8x128xf32>
    %22 = arith.addf %19, %21 : vector<8x128xf32>
    %cst_17 = arith.constant dense<0xFF800000> : vector<8xf32>
    %23 = vector.multi_reduction <maximumf>, %22, %cst_17 [1] : vector<8x128xf32> to vector<8xf32>
    %24 = vector.shape_cast %23 : vector<8xf32> to vector<8x1xf32>
    %25 = vector.broadcast %24 : vector<8x1xf32> to vector<8x128xf32>
    %26 = arith.subf %22, %25 : vector<8x128xf32>
    %27 = math.exp %26 : vector<8x128xf32>
    %cst_18 = arith.constant dense<0.000000e+00> : vector<8xf32>
    %28 = vector.multi_reduction <add>, %27, %cst_18 [1] : vector<8x128xf32> to vector<8xf32>
    %29 = vector.shape_cast %28 : vector<8xf32> to vector<8x1xf32>
    %30 = tpu.reciprocal %29 {approx = true} : vector<8x1xf32> -> vector<8x1xf32>
    %31 = vector.broadcast %30 : vector<8x1xf32> to vector<8x128xf32>
    %32 = arith.mulf %27, %31 : vector<8x128xf32>
    %33 = arith.truncf %32 : vector<8x128xf32> to vector<8x128xbf16>
    %c0_19 = arith.constant 0 : index
    %c0_20 = arith.constant 0 : index
    %34 = vector.load %arg8[%c0_19, %c0_20] : memref<8x128xbf16, #tpu.memory_space<vmem>>, vector<8x128xbf16>
    tpu.vector_store %arg8[%c0_19, %c0_20], %33 {strides = array<i32>} : memref<8x128xbf16, #tpu.memory_space<vmem>>, vector<8x128xbf16>,
    return
  }
  func.func @transform_0(%arg0: i32) -> (i32, i32) {
    %c0_i32 = arith.constant 0 : i32
    %c0_i32_0 = arith.constant 0 : i32
    return %arg0, %c0_i32 : i32, i32
  }
  func.func @transform_1(%arg0: i32) -> (i32, i32) {
    %c0_i32 = arith.constant 0 : i32
    %c0_i32_0 = arith.constant 0 : i32
    %c0_i32_1 = arith.constant 0 : i32
    return %c0_i32, %c0_i32_0 : i32, i32
  }
  func.func @transform_2(%arg0: i32) -> (i32, i32) {
    %c0_i32 = arith.constant 0 : i32
    %c0_i32_0 = arith.constant 0 : i32
    %c0_i32_1 = arith.constant 0 : i32
    return %c0_i32, %c0_i32_0 : i32, i32
  }
  func.func @transform_3(%arg0: i32) -> (i32, i32) {
    %c0_i32 = arith.constant 0 : i32
    %c0_i32_0 = arith.constant 0 : i32
    %c0_i32_1 = arith.constant 0 : i32
    return %c0_i32, %c0_i32_0 : i32, i32
  }
  func.func @transform_4(%arg0: i32) -> (i32, i32) {
    %c0_i32 = arith.constant 0 : i32
    %c0_i32_0 = arith.constant 0 : i32
    %c0_i32_1 = arith.constant 0 : i32
    return %c0_i32, %c0_i32_0 : i32, i32
  }
  func.func @transform_5(%arg0: i32) -> (i32, i32) {
    %c0_i32 = arith.constant 0 : i32
    %c0_i32_0 = arith.constant 0 : i32
    %c0_i32_1 = arith.constant 0 : i32
    return %c0_i32, %c0_i32_0 : i32, i32
  }
  func.func @transform_6(%arg0: i32) -> (i32, i32) {
    %c0_i32 = arith.constant 0 : i32
    %c0_i32_0 = arith.constant 0 : i32
    %c0_i32_1 = arith.constant 0 : i32
    return %c0_i32, %c0_i32_0 : i32, i32
  }
  func.func @transform_7(%arg0: i32) -> (i32, i32) {
    %c0_i32 = arith.constant 0 : i32
    %c0_i32_0 = arith.constant 0 : i32
    return %arg0, %c0_i32 : i32, i32
  }
}

</mosaic_0001>

<bundles_post_ra>
// kernel: tpu_custom_call.1
= control target key start
LH: loop header
LB: loop body
LE: loop exit
PB: predicated region body
PF: predicated region fallthrough
CT: control target
= control target key end

     0   :  { %12 = vsyncpa [#allocation3], 0  ;;  %s1142_s0 = inlined_call_operand.hbm [shape: f32[8,144], index: 0, kind: input, shape index: {}]   ;;  %s1143_s1 = inlined_call_operand.hbm [shape: bf16[144,256], index: 1, kind: input, shape index: {}]   ;;  %s1144_s2 = inlined_call_operand.vmem [shape: f32[1,256], index: 2, kind: input, shape index: {}]   ;;  %s1145_s3 = inlined_call_operand.hbm [shape: bf16[256,256], index: 3, kind: input, shape index: {}]   ;;  %s1146_s4 = inlined_call_operand.vmem [shape: f32[1,256], index: 4, kind: input, shape index: {}]   ;;  %s1147_s5 = inlined_call_operand.hbm [shape: bf16[256,128], index: 5, kind: input, shape index: {}]   ;;  %s1148_s6 = inlined_call_operand.vmem [shape: f32[1,128], index: 6, kind: input, shape index: {}]   ;;  %s1149_s7 = inlined_call_operand.hbm [shape: bf16[8,128], index: 7, kind: output, shape index: {}]  }
   0x1   :  { %13 = vsyncpa [#allocation6], 0 }
   0x2   :  { %14 = vsyncpa [#allocation9], 0 }
   0x3   :  { %15 = vsyncpa [#allocation4], 0  ;;  %s1018_s24 = smov [#allocation5]   ;;  %s900_s28 = scalar_lea.hbm %s1143_s1, 2304 }
   0x4   :  { %s31_s25 = sshll.u32 %s1018_s24, 4  ;;  %p901_p0 = scmp.ne.s32.totalorder %s1143_s1, %s900_s28  ;;  %s32_s25 = int_to_ptr.vmem [resolvable:$true] %s31_s25 }
   0x5   :  { %p904_p1 = scmp.lt.u32.totalorder %s900_s28, %s1143_s1 }
   0x7   :  { %p906_p2 = pnand %p904_p1, %p901_p0 }
   0x9   :  { %909 = shalt.err (!%p906_p2)
}
   0xa   :  { %s910_s10 = scalar_lea.vmem %s32_s25, 2304  ;;  %p915_p4 = scmp.lt.s32.totalorder %s32_s25, %s32_s25 }
   0xb   :  { %p911_p3 = scmp.ne.s32.totalorder %s32_s25, %s910_s10  ;;  %p916_p5 = scmp.lt.s32.totalorder %s910_s10, %s910_s10 }
   0xd   :  { %p917_p6 = por %p916_p5, %p915_p4 }
   0xf   :  { %p918_p7 = pnand %p917_p6, %p911_p3 }
  0x11   :  { %921 = shalt.err (!%p918_p7)
}
  0x12   :  { %s1019_s11 = smov 128   ;;  %s1020_s12 = smov 8  }
  0x13   :  { %37 = dma.hbm_to_vmem [thread:$0]  %s1143_s1, 2304, %s32_s25, [#allocation6], %s1019_s11, %s1019_s11, %s1020_s12  }
  0x14   :  { %s1021_s15 = smov [#allocation2]   ;;  %s1022_s17 = smov [#allocation7]  }
  0x15   :  { %s22_s16 = sshll.u32 %s1021_s15, 4  ;;  %s45_s18 = sshll.u32 %s1022_s17, 4  ;;  %s23_s16 = int_to_ptr.vmem [resolvable:$true] %s22_s16  ;;  %s46_s18 = int_to_ptr.vmem [resolvable:$true] %s45_s18 }
  0x16   :  { %s922_s21 = scalar_lea.hbm %s1142_s0, 256 }
  0x17   :  { %p923_p8 = scmp.ne.s32.totalorder %s1142_s0, %s922_s21  ;;  %p926_p9 = scmp.lt.u32.totalorder %s922_s21, %s1142_s0 }
  0x19   :  { %p928_p10 = pnand %p926_p9, %p923_p8 }
  0x1b   :  { %931 = shalt.err (!%p928_p10)
}
  0x1c   :  { %s932_s1 = scalar_lea.vmem %s23_s16, 256  ;;  %p937_p12 = scmp.lt.s32.totalorder %s23_s16, %s23_s16 }
  0x1d   :  { %p933_p11 = scmp.ne.s32.totalorder %s23_s16, %s932_s1  ;;  %p938_p13 = scmp.lt.s32.totalorder %s932_s1, %s932_s1 }
  0x1f   :  { %p939_p0 = por %p938_p13, %p937_p12 }
  0x21   :  { %p940_p1 = pnand %p939_p0, %p933_p11 }
  0x23   :  { %943 = shalt.err (!%p940_p1)
}
  0x24   :  { %25 = dma.hbm_to_vmem [thread:$0]  %s1142_s0, 256, %s23_s16, [#allocation3]  }
  0x25   :  { %s944_s30 = scalar_lea.hbm %s1145_s3, 4096 }
  0x26   :  { %p945_p2 = scmp.ne.s32.totalorder %s1145_s3, %s944_s30  ;;  %p948_p3 = scmp.lt.u32.totalorder %s944_s30, %s1145_s3 }
  0x28   :  { %p950_p4 = pnand %p948_p3, %p945_p2 }
  0x2a   :  { %953 = shalt.err (!%p950_p4)
}
  0x2b   :  { %s954_s14 = scalar_lea.vmem %s46_s18, 4096  ;;  %p959_p6 = scmp.lt.s32.totalorder %s46_s18, %s46_s18 }
  0x2c   :  { %p955_p5 = scmp.ne.s32.totalorder %s46_s18, %s954_s14  ;;  %p960_p7 = scmp.lt.s32.totalorder %s954_s14, %s954_s14 }
  0x2e   :  { %p961_p8 = por %p960_p7, %p959_p6 }
  0x30   :  { %p962_p9 = pnand %p961_p8, %p955_p5 }
  0x32   :  { %965 = shalt.err (!%p962_p9)
}
  0x33   :  { %51 = dma.hbm_to_vmem [thread:$0]  %s1145_s3, 4096, %s46_s18, [#allocation6], %s1019_s11, %s1019_s11, %s1020_s12  }
  0x34   :  { %s1023_s16 = smov [#allocation8]   ;;  %s966_s21 = scalar_lea.hbm %s1147_s5, 2048 }
  0x35   :  { %s59_s17 = sshll.u32 %s1023_s16, 4  ;;  %p967_p10 = scmp.ne.s32.totalorder %s1147_s5, %s966_s21  ;;  %s60_s17 = int_to_ptr.vmem [resolvable:$true] %s59_s17 }
  0x36   :  { %p970_p11 = scmp.lt.u32.totalorder %s966_s21, %s1147_s5 }
  0x38   :  { %p972_p12 = pnand %p970_p11, %p967_p10 }
  0x3a   :  { %975 = shalt.err (!%p972_p12)
}
  0x3b   :  { %s976_s1 = scalar_lea.vmem %s60_s17, 2048  ;;  %p981_p0 = scmp.lt.s32.totalorder %s60_s17, %s60_s17 }
  0x3c   :  { %p977_p13 = scmp.ne.s32.totalorder %s60_s17, %s976_s1  ;;  %p982_p1 = scmp.lt.s32.totalorder %s976_s1, %s976_s1 }
  0x3e   :  { %p983_p2 = por %p982_p1, %p981_p0 }
  0x40   :  { %p984_p3 = pnand %p983_p2, %p977_p13 }
  0x42   :  { %987 = shalt.err (!%p984_p3)
}
  0x43   :  { %s1024_s3 = smov 64   ;;  %s1025_s11 = smov 4  }
  0x44   :  { %65 = dma.hbm_to_vmem [thread:$0]  %s1147_s5, 2048, %s60_s17, [#allocation9], %s1024_s3, %s1024_s3, %s1025_s11  }
  0x45   :  { %1010 = dma.done.wait [#allocation3], 256  }
  0x46   :  { %1011 = vsyncadd [#allocation3], 4294967040 }
  0x47   :  { %1012 = dma.done.wait [#allocation6], 6400  }
  0x48   :  { %1013 = vsyncadd [#allocation6], 4294960896 }
  0x49   :  { %1014 = dma.done.wait [#allocation9], 2048  }
  0x4a   :  { %1015 = vsyncadd [#allocation9], 4294965248  ;;  %v805_v0 = vld [vmem:[#allocation5 + $0x4] ss:$8 sps:$4 sm:$0xff]   ;;  %v807_v1 = vld [vmem:[#allocation5] ss:$8 sps:$4 sm:$0xff]  }
  0x4b   :  { %209 = vmatprep.subr.bf16.mxu0 %v805_v0  ;;  %v808_v2 = vld [vmem:[#allocation5 + $0x14] ss:$8 sps:$4 sm:$0xff]   ;;  %v810_v3 = vld [vmem:[#allocation5 + $0x10] ss:$8 sps:$4 sm:$0xff]   ;;  %v811_v4 = vld [vmem:[#allocation5 + $0x24] ss:$8 sps:$4 sm:$0xff]  }
  0x4c   :  { %210 = vmatpush1.bf16.msra.mxu0 %v807_v1  ;;  %v813_v5 = vld [vmem:[#allocation5 + $0x20] ss:$8 sps:$4 sm:$0xff]   ;;  %v814_v6 = vld [vmem:[#allocation5 + $0x34] ss:$8 sps:$4 sm:$0xff]   ;;  %v816_v7 = vld [vmem:[#allocation5 + $0x30] ss:$8 sps:$4 sm:$0xff]  }
  0x4d   :  { %211 = vmatprep.subr.bf16.mxu0 %v808_v2  ;;  %v817_v8 = vld [vmem:[#allocation5 + $0x44] ss:$8 sps:$4 sm:$0xff]   ;;  %v82_v9 = vld [vmem:[#allocation2 + $0x8] sm:$0xff]  ;;  %vm205_vm0 = vcmask 130048   ;;  %v819_v14 = vld [vmem:[#allocation5 + $0x40] ss:$8 sps:$4 sm:$0xff]   ;;  %v105_v2 = vlaneseq }
  0x4e   :  { %v84_v10 = vpack.c.bf16 %v82_v9, %v82_v9  ;;  %v832_v11 = vld [vmem:[#allocation7 + $0x4] ss:$8 sps:$4 sm:$0xff]   ;;  %v834_v12 = vld [vmem:[#allocation7] ss:$8 sps:$4 sm:$0xff]   ;;  %v835_v13 = vld [vmem:[#allocation7 + $0x14] ss:$8 sps:$4 sm:$0xff]  }
  0x4f   :  { %v820_v15 = vld [vmem:[#allocation5 + $0x54] ss:$8 sps:$4 sm:$0xff]   ;;  %458 = vmatprep.subr.bf16.mxu1 %v832_v11  ;;  %v837_v16 = vld [vmem:[#allocation7 + $0x10] ss:$8 sps:$4 sm:$0xff]   ;;  %v822_v18 = vld [vmem:[#allocation5 + $0x50] ss:$8 sps:$4 sm:$0xff]  }
  0x50   :  { %212 = vmatpush1.bf16.msra.mxu0 %v810_v3  ;;  %724 = vmatprep.mubr.msk.bf16.mxu0 %vm205_vm0, %v84_v10  ;;  %v838_v17 = vld [vmem:[#allocation7 + $0x24] ss:$8 sps:$4 sm:$0xff]   ;;  %v823_v19 = vld [vmem:[#allocation5 + $0x64] ss:$8 sps:$4 sm:$0xff]   ;;  %v840_v20 = vld [vmem:[#allocation7 + $0x20] ss:$8 sps:$4 sm:$0xff]  }
  0x51   :  { %213 = vmatprep.subr.bf16.mxu0 %v811_v4  ;;  %459 = vmatpush1.bf16.msra.mxu1 %v834_v12  ;;  %v841_v21 = vld [vmem:[#allocation7 + $0x34] ss:$8 sps:$4 sm:$0xff]   ;;  %v825_v22 = vld [vmem:[#allocation5 + $0x60] ss:$8 sps:$4 sm:$0xff]   ;;  %v826_v23 = vld [vmem:[#allocation5 + $0x74] ss:$8 sps:$4 sm:$0xff]  }
  0x52   :  { %460 = vmatprep.subr.bf16.mxu1 %v835_v13  ;;  %v843_v24 = vld [vmem:[#allocation7 + $0x30] ss:$8 sps:$4 sm:$0xff]   ;;  %v844_v25 = vld [vmem:[#allocation7 + $0x44] ss:$8 sps:$4 sm:$0xff]   ;;  %v828_v26 = vld [vmem:[#allocation5 + $0x70] ss:$8 sps:$4 sm:$0xff]  }
  0x53   :  { %v829_v27 = vld [vmem:[#allocation5 + $0x84] ss:$8 sps:$4 sm:$0xff]   ;;  %v831_v28 = vld [vmem:[#allocation5 + $0x80] ss:$8 sps:$4 sm:$0xff]   ;;  %v846_v29 = vld [vmem:[#allocation7 + $0x40] ss:$8 sps:$4 sm:$0xff]  }
  0x54   :  { %214 = vmatpush1.bf16.msra.mxu0 %v813_v5  ;;  %v847_v30 = vld [vmem:[#allocation7 + $0x54] ss:$8 sps:$4 sm:$0xff]   ;;  %v81_v31 = vld [vmem:[#allocation2] sm:$0xff]  ;;  %v849_v32 = vld [vmem:[#allocation7 + $0x50] ss:$8 sps:$4 sm:$0xff]   ;;  %v106_v3 = vshrl.u32 %v105_v2, 7 }
  0x55   :  { %215 = vmatprep.subr.bf16.mxu0 %v814_v6  ;;  %461 = vmatpush1.bf16.msra.mxu1 %v837_v16  ;;  %v850_v33 = vld [vmem:[#allocation7 + $0x64] ss:$8 sps:$4 sm:$0xff]   ;;  %v83_v34 = vpack.c.bf16 %v81_v31, %v81_v31  ;;  %v852_v35 = vld [vmem:[#allocation7 + $0x60] ss:$8 sps:$4 sm:$0xff]   ;;  %v853_v36 = vld [vmem:[#allocation7 + $0x74] ss:$8 sps:$4 sm:$0xff]  }
  0x56   :  { %462 = vmatprep.subr.bf16.mxu1 %v838_v17  ;;  %v855_v37 = vld [vmem:[#allocation7 + $0x70] ss:$8 sps:$4 sm:$0xff]   ;;  %v856_v38 = vld [vmem:[#allocation7 + $0x84] ss:$8 sps:$4 sm:$0xff]   ;;  %v858_v39 = vld [vmem:[#allocation7 + $0x80] ss:$8 sps:$4 sm:$0xff]  }
  0x57   :  { %v859_v40 = vld [vmem:[#allocation7 + $0x94] ss:$8 sps:$4 sm:$0xff]   ;;  %v861_v41 = vld [vmem:[#allocation7 + $0x90] ss:$8 sps:$4 sm:$0xff]   ;;  %v862_v42 = vld [vmem:[#allocation7 + $0xa4] ss:$8 sps:$4 sm:$0xff]  }
  0x58   :  { %216 = vmatpush1.bf16.msra.mxu0 %v816_v7  ;;  %v864_v43 = vld [vmem:[#allocation7 + $0xa0] ss:$8 sps:$4 sm:$0xff]   ;;  %v865_v44 = vld [vmem:[#allocation7 + $0xb4] ss:$8 sps:$4 sm:$0xff]   ;;  %v867_v45 = vld [vmem:[#allocation7 + $0xb0] ss:$8 sps:$4 sm:$0xff]  }
  0x59   :  { %217 = vmatprep.subr.bf16.mxu0 %v817_v8  ;;  %463 = vmatpush1.bf16.msra.mxu1 %v840_v20  ;;  %v868_v46 = vld [vmem:[#allocation7 + $0xc4] ss:$8 sps:$4 sm:$0xff]   ;;  %v870_v47 = vld [vmem:[#allocation7 + $0xc0] ss:$8 sps:$4 sm:$0xff]   ;;  %v871_v48 = vld [vmem:[#allocation7 + $0xd4] ss:$8 sps:$4 sm:$0xff]  }
  0x5a   :  { %464 = vmatprep.subr.bf16.mxu1 %v841_v21  ;;  %v873_v49 = vld [vmem:[#allocation7 + $0xd0] ss:$8 sps:$4 sm:$0xff]   ;;  %v874_v50 = vld [vmem:[#allocation7 + $0xe4] ss:$8 sps:$4 sm:$0xff]   ;;  %v876_v51 = vld [vmem:[#allocation7 + $0xe0] ss:$8 sps:$4 sm:$0xff]  }
  0x5b   :  { %v877_v52 = vld [vmem:[#allocation7 + $0xf4] ss:$8 sps:$4 sm:$0xff]   ;;  %v879_v53 = vld [vmem:[#allocation7 + $0xf0] ss:$8 sps:$4 sm:$0xff]   ;;  %v880_v54 = vld [vmem:[#allocation8 + $0x40] sm:$0xff]   ;;  %v107_v4 = vsub.s32 0, %v106_v3 }
  0x5c   :  { %218 = vmatpush1.bf16.msra.mxu0 %v819_v14  ;;  %v881_v55 = vld [vmem:[#allocation8] sm:$0xff]   ;;  %v882_v56 = vld [vmem:[#allocation8 + $0x48] sm:$0xff]   ;;  %v884_v58 = vld [vmem:[#allocation8 + $0x50] sm:$0xff]   ;;  %v111_v6 = vsub.s32 1, %v106_v3 }
  0x5d   :  { %219 = vmatprep.subr.bf16.mxu0 %v820_v15  ;;  %465 = vmatpush1.bf16.msra.mxu1 %v843_v24  ;;  %v883_v57 = vld [vmem:[#allocation8 + $0x8] sm:$0xff]   ;;  %v885_v59 = vld [vmem:[#allocation8 + $0x10] sm:$0xff]   ;;  %v886_v60 = vld [vmem:[#allocation8 + $0x58] sm:$0xff]  }
  0x5e   :  { %466 = vmatprep.subr.bf16.mxu1 %v844_v25  ;;  %v887_v61 = vld [vmem:[#allocation8 + $0x18] sm:$0xff]   ;;  %v888_v62 = vld [vmem:[#allocation8 + $0x60] sm:$0xff]   ;;  %v890_v0 = vld [vmem:[#allocation8 + $0x68] sm:$0xff]  }
  0x5f   :  { %v889_v63 = vld [vmem:[#allocation8 + $0x20] sm:$0xff]   ;;  %v891_v1 = vld [vmem:[#allocation8 + $0x28] sm:$0xff]   ;;  %v893_v20 = vld [vmem:[#allocation8 + $0x30] sm:$0xff]  }
  0x60   :  { %220 = vmatpush1.bf16.msra.mxu0 %v822_v18  ;;  %v103_v5 = vld [vmem:[%s1144_s2] sm:$0x3]  ;;  %v894_v21 = vld [vmem:[#allocation8 + $0x78] sm:$0xff]  }
  0x61   :  { %221 = vmatprep.subr.bf16.mxu0 %v823_v19  ;;  %467 = vmatpush1.bf16.msra.mxu1 %v846_v29  ;;  %v108_v7 = vrot.slane %v103_v5, %v107_v4  ;;  %v112_v8 = vrot.slane %v103_v5, %v111_v6  ;;  %v892_v19 = vld [vmem:[#allocation8 + $0x70] sm:$0xff]  }
  0x62   :  { %468 = vmatprep.subr.bf16.mxu1 %v847_v30 }
  0x64   :  { %222 = vmatpush1.bf16.msra.mxu0 %v825_v22  ;;  %v895_v22 = vld [vmem:[#allocation8 + $0x38] sm:$0xff]  }
  0x65   :  { %223 = vmatprep.subr.bf16.mxu0 %v826_v23  ;;  %469 = vmatpush1.bf16.msra.mxu1 %v849_v32  ;;  %v286_v23 = vld [vmem:[%s1146_s4] sm:$0x3]  ;;  %s1026_s4 = smov [#allocation10]  }
  0x66   :  { %470 = vmatprep.subr.bf16.mxu1 %v850_v33  ;;  %v291_v24 = vrot.slane %v286_v23, %v107_v4  ;;  %v295_v25 = vrot.slane %v286_v23, %v111_v6  ;;  %s695_s30 = sshll.u32 %s1026_s4, 4  ;;  %s696_s30 = int_to_ptr.vmem [resolvable:$true] %s695_s30 }
  0x67   :  { %p993_p5 = scmp.lt.s32.totalorder %s696_s30, %s696_s30 }
  0x68   :  { %224 = vmatpush1.bf16.msra.mxu0 %v828_v26 }
  0x69   :  { %225 = vmatprep.subr.bf16.mxu0 %v829_v27  ;;  %471 = vmatpush1.bf16.msra.mxu1 %v852_v35 }
  0x6a   :  { %472 = vmatprep.subr.bf16.mxu1 %v853_v36 }
  0x6c   :  { %226 = vmatpush1.bf16.msra.mxu0 %v831_v28 }
  0x6d   :  { %473 = vmatpush1.bf16.msra.mxu1 %v855_v37  ;;  %774 = vmatprep.subr.bf16.mxu0 %v880_v54 }
  0x6e   :  { %474 = vmatprep.subr.bf16.mxu1 %v856_v38  ;;  %v757_v38 = vld [vmem:[%s1148_s6] ss:$0 sm:$0xff]  ;;  %s988_s6 = scalar_lea.vmem %s696_s30, 64 }
  0x6f   :  { %242 = vmatmul.mubr.bf16.vlgmr.msra.gmra.mrb[0].mxu0 %v83_v34  ;;  %p989_p4 = scmp.ne.s32.totalorder %s696_s30, %s988_s6  ;;  %p994_p6 = scmp.lt.s32.totalorder %s988_s6, %s988_s6 }
  0x70   :  { %775 = vmatpush3.bf16.msra.mxu0 %v881_v55 }
  0x71   :  { %475 = vmatpush1.bf16.msra.mxu1 %v858_v39  ;;  %776 = vmatprep.subr.bf16.mxu0 %v882_v56  ;;  %p995_p7 = por %p994_p6, %p993_p5 }
  0x72   :  { %476 = vmatprep.subr.bf16.mxu1 %v859_v40 }
  0x73   :  { %p996_p8 = pnand %p995_p7, %p989_p4 }
  0x74   :  { %777 = vmatpush3.bf16.msra.mxu0 %v883_v57 }
  0x75   :  { %477 = vmatpush1.bf16.msra.mxu1 %v861_v41  ;;  %778 = vmatprep.subr.bf16.mxu0 %v884_v58 }
  0x76   :  { %478 = vmatprep.subr.bf16.mxu1 %v862_v42 }
  0x78   :  { %779 = vmatpush3.bf16.msra.mxu0 %v885_v59 }
  0x79   :  { %479 = vmatpush1.bf16.msra.mxu1 %v864_v43  ;;  %780 = vmatprep.subr.bf16.mxu0 %v886_v60 }
  0x7a   :  { %480 = vmatprep.subr.bf16.mxu1 %v865_v44 }
  0x7c   :  { %781 = vmatpush3.bf16.msra.mxu0 %v887_v61 }
  0x7d   :  { %481 = vmatpush1.bf16.msra.mxu1 %v867_v45  ;;  %782 = vmatprep.subr.bf16.mxu0 %v888_v62 }
  0x7e   :  { %482 = vmatprep.subr.bf16.mxu1 %v868_v46 }
  0x80   :  { %783 = vmatpush3.bf16.msra.mxu0 %v889_v63 }
  0x81   :  { %483 = vmatpush1.bf16.msra.mxu1 %v870_v47  ;;  %784 = vmatprep.subr.bf16.mxu0 %v890_v0 }
  0x82   :  { %484 = vmatprep.subr.bf16.mxu1 %v871_v48 }
  0x84   :  { %785 = vmatpush3.bf16.msra.mxu0 %v891_v1 }
  0x85   :  { %485 = vmatpush1.bf16.msra.mxu1 %v873_v49  ;;  %786 = vmatprep.subr.bf16.mxu0 %v892_v19 }
  0x86   :  { %486 = vmatprep.subr.bf16.mxu1 %v874_v50 }
  0x88   :  { %787 = vmatpush3.bf16.msra.mxu0 %v893_v20 }
  0x89   :  { %487 = vmatpush1.bf16.msra.mxu1 %v876_v51  ;;  %788 = vmatprep.subr.bf16.mxu0 %v894_v21 }
  0x8a   :  { %488 = vmatprep.subr.bf16.mxu1 %v877_v52 }
  0x8c   :  { %789 = vmatpush3.bf16.msra.mxu0 %v895_v22 }
  0x8d   :  { %489 = vmatpush1.bf16.msra.mxu1 %v879_v53 }
 0x142   :  { %v243_v9 = vpop.f32.mrb[0].mxu0 }
 0x143   :  { %v244_v10 = vadd.f32 %v243_v9, %v108_v7  ;;  %v245_v11 = vpop.f32.mrb[1].mxu0 }
 0x144   :  { %v246_v12 = vadd.f32 %v245_v11, %v112_v8  ;;  %v247_v13 = vpop.f32.mrb[2].mxu0 }
 0x145   :  { %v250_v14 = vmax.f32 %v244_v10, 0.0  ;;  %v248_v15 = vpop.f32.mrb[3].mxu0 }
 0x146   :  { %v251_v16 = vmax.f32 %v246_v12, 0.0 }
 0x147   :  { %v252_v18 = vpack.c.bf16 %v250_v14, %v250_v14 }
 0x148   :  { %v253_v17 = vpack.c.bf16 %v251_v16, %v251_v16 }
 0x14a   :  { %490 = vmatprep.mubr.bf16.mxu1 %v253_v17 }
 0x14b   :  { %491 = vmatmul.mubr.bf16.vlgmr.msra.gmra.mrb[0].mxu1 %v252_v18 }
 0x21e   :  { %v492_v26 = vpop.f32.mrb[0].mxu1 }
 0x21f   :  { %v493_v27 = vadd.f32 %v492_v26, %v291_v24  ;;  %v494_v28 = vpop.f32.mrb[1].mxu1 }
 0x220   :  { %v495_v29 = vadd.f32 %v494_v28, %v295_v25  ;;  %v496_v30 = vpop.f32.mrb[2].mxu1 }
 0x221   :  { %v499_v31 = vmax.f32 %v493_v27, 0.0  ;;  %v497_v32 = vpop.f32.mrb[3].mxu1 }
 0x222   :  { %v500_v33 = vmax.f32 %v495_v29, 0.0 }
 0x223   :  { %v501_v35 = vpack.c.bf16 %v499_v31, %v499_v31 }
 0x224   :  { %v502_v34 = vpack.c.bf16 %v500_v33, %v500_v33 }
 0x226   :  { %670 = vmatprep.mubr.bf16.mxu0 %v502_v34 }
 0x227   :  { %671 = vmatmul.mubr.bf16.vlgmr.msra.gmra.mrb[4].mxu0 %v501_v35 }
 0x2fa   :  { %v790_v36 = vpop.f32.mrb[4].mxu0 }
 0x2fb   :  { %v791_v37 = vpop.f32.mrb[5].mxu0 }
 0x2fc   :  { %v792_v39 = vadd.f32 %v791_v37, %v790_v36  ;;  %v793_v40 = vpop.f32.mrb[6].mxu0 }
 0x2fd   :  { %v794_v41 = vpop.f32.mrb[7].mxu0 }
 0x2fe   :  { %v673_v42 = vadd.f32 %v792_v39, %v757_v38 }
 0x300   :  { %678 = vmax.xlane.f32.xlu0 %v673_v42 }
 0x38d   :  { %v679_v43 = vpop.xlane.xlu0 %678 }
 0x38e   :  { %v680_v44 = vsub.f32 %v673_v42, %v679_v43 }
 0x390   :  { %v681_v45 = vmul.f32 1.442695, %v680_v44 }
 0x392   :  { %896 = vpow2.f32 %v681_v45 }
 0x39c   :  { %v897_v46 = vpop.eup %896 }
 0x39d   :  { %683 = vadd.xlane.f32.xlu0 %v897_v46 }
 0x42a   :  { %v684_v47 = vpop.xlane.xlu0 %683 }
 0x42b   :  { %898 = vrcp.f32 %v684_v47 }
 0x435   :  { %v899_v48 = vpop.eup %898 }
 0x436   :  { %v686_v49 = vmul.f32 %v899_v48, %v897_v46 }
 0x438   :  { %v687_v50 = vpack.c.bf16 %v686_v49, %v686_v49 }
 0x43a   :  { %688 = vst [vmem:[#allocation10] sm:$0xf] %v687_v50 }
 0x43b   :  { %999 = shalt.err (!%p996_p8)
}
 0x43c   :  { %s1000_s10 = scalar_lea.hbm %s1149_s7, 64 }
 0x43d   :  { %p1001_p9 = scmp.ne.s32.totalorder %s1149_s7, %s1000_s10  ;;  %p1004_p10 = scmp.lt.u32.totalorder %s1000_s10, %s1149_s7 }
 0x43f   :  { %p1006_p11 = pnand %p1004_p10, %p1001_p9 }
 0x441   :  { %1009 = shalt.err (!%p1006_p11)
}
 0x442   :  { %698 = dma.vmem_to_hbm [thread:$0]  %s696_s30, 64, %s1149_s7, [#allocation4]  }
 0x443   :  { %1016 = dma.done.wait [#allocation4], 64  }
 0x444   :  { %1017 = vsyncadd [#allocation4], 4294967232 }
 0x445   :  { %702 = vsyncpa [#allocation3], 1 }
 0x446   :  { %703 = vsyncpa [#allocation6], 1 }
 0x447   :  { %704 = vsyncpa [#allocation9], 1 }
 0x448   :  { %705 = vsyncpa [#allocation4], 1 }

</bundles_post_ra>
